<compile_context>
chip_gen: v7x
topology: tpu7x:2x2x1
jax: 0.10.0
libtpu: 0.0.40
codegen_flags: <defaults>
</compile_context>

<pallas_src>
import functools
import itertools

import numpy as np
import jax
import jax.numpy as jnp
from jax.experimental import pallas as pl
from jax.experimental.pallas import tpu as pltpu


def _round_up(x, m):
    return ((x + m - 1) // m) * m


# ----------------------------- Pallas kernel ------------------------------ #
def _matcher_cost_kernel(logits_ref, boxes8_ref, onehot_ref, tgt_ref, tgtn_ref, c_ref,
                         *, w_class, w_giou):
    # --- classification cost: -w_class * softmax(logits)[:, tgt_ids] (use_focal=False path)
    # normalization and -w_class folded AFTER the matmul into one [tile, 1] scale
    # (reciprocal on the EUP, weight never touches the [tile, T] domain).
    logits = logits_ref[...]                                           # [tile, C_pad] f32
    m = jnp.max(logits, axis=-1, keepdims=True)
    e = jnp.exp(logits - m)                                            # padded lanes -> 0
    scale = pl.reciprocal(jnp.sum(e, axis=-1, keepdims=True), approx=False) * (-w_class)
    acc = jnp.dot(e, onehot_ref[...],
                  preferred_element_type=jnp.float32,
                  precision=jax.lax.Precision.HIGHEST) * scale         # [tile, T]

    bx = boxes8_ref[...]                                               # [tile, 8]
    tgt = tgt_ref[...]                                                 # [4, T]
    tgtn = tgtn_ref[...]                                               # [4, T] (w_bbox-scaled)

    # --- L1 cdist on w_bbox-pre-scaled normalized boxes (no per-element weight multiply)
    for k in range(4):
        acc = acc + jnp.abs(bx[:, 4 + k:5 + k] - tgtn[k:k + 1, :])

    # --- generalized IoU cost on raw xyxy boxes
    # giou = inter/union - 1 + union/area_c, so -w_giou*giou = w_giou*(1 - term)
    x1, y1, x2, y2 = (bx[:, k:k + 1] for k in range(4))                # [tile, 1]
    tx1, ty1, tx2, ty2 = (tgt[k:k + 1, :] for k in range(4))           # [1, T]
    area1 = (x2 - x1) * (y2 - y1)
    area2 = (tx2 - tx1) * (ty2 - ty1)
    inter = (jnp.maximum(jnp.minimum(x2, tx2) - jnp.maximum(x1, tx1), 0.0) *
             jnp.maximum(jnp.minimum(y2, ty2) - jnp.maximum(y1, ty1), 0.0))
    union = area1 + area2 - inter
    area_c = (jnp.maximum(jnp.maximum(x2, tx2) - jnp.minimum(x1, tx1), 0.0) *
              jnp.maximum(jnp.maximum(y2, ty2) - jnp.minimum(y1, ty1), 0.0))
    term = (inter * pl.reciprocal(union, approx=False)
            + union * pl.reciprocal(area_c, approx=False))
    c_ref[...] = acc + w_giou * (1.0 - term)


def matcher_cost_matrix(pred_logits, pred_boxes, tgt_ids, tgt_boxes,
                        image_size_out, image_size_tgt,
                        cost_class=1.0, cost_bbox=1.0, cost_giou=1.0,
                        tile_n=256):
    """Returns the [N, T] matching-cost matrix (N = bs*num_queries, T = total targets)."""
    N, C = pred_logits.shape
    T = int(tgt_ids.shape[0])
    w_bbox = float(cost_bbox)

    # Lane-dense class axis: pad C to a multiple of 128 with -1e30 (exp -> 0, bit-identical
    # softmax), turning the softmax vregs / MXU K dim dense and the logits rows into 512 B.
    C_pad = _round_up(max(C, 1), 128)
    logits_c = jnp.pad(pred_logits.astype(jnp.float32), ((0, 0), (0, C_pad - C)),
                       constant_values=-1e30)

    # Pre-normalize + pre-scale boxes in the wrapper and pack raw/normalized boxes into one
    # [N, 8] stream: fewer DMA streams and no per-tile divides / weight multiplies in-kernel.
    boxes_raw = pred_boxes.astype(jnp.float32)
    boxes_norm = (boxes_raw / image_size_out.astype(jnp.float32)) * w_bbox
    boxes8 = jnp.concatenate([boxes_raw, boxes_norm], axis=1)          # [N, 8]
    tgt_norm = (tgt_boxes.astype(jnp.float32) / image_size_tgt.astype(jnp.float32)) * w_bbox

    # Target axis padded lane-dense (multiple of 128) with NON-degenerate dummy boxes
    # so padded GIoU columns never hit 0/0; tile the T axis so the resident target-side
    # operands and the output tile stay bounded on v7x's smaller VMEM.
    T_pad = _round_up(max(T, 1), 128)
    tile_t = next(t for t in (512, 256, 128) if T_pad % t == 0)

    # N-axis tiling: cap tile_n so the grid has >= 2 parallel steps (both v7x TensorCores).
    tile_n = min(tile_n, _round_up(N, 8))
    if _round_up(N, tile_n) // tile_n < 2 and tile_n > 8:
        tile_n = max(8, _round_up(tile_n // 2, 8))
    N_pad = _round_up(N, tile_n)

    dummy_box = jnp.array([0.0, 0.0, 1.0, 1.0], jnp.float32)
    dummy8 = jnp.concatenate([dummy_box, dummy_box * w_bbox])

    def pad_rows(x, n_pad, fill_row):
        pad = n_pad - x.shape[0]
        if pad == 0:
            return x
        filler = jnp.broadcast_to(fill_row, (pad, x.shape[1])).astype(x.dtype)
        return jnp.concatenate([x, filler], axis=0)

    logits_p = pad_rows(logits_c, N_pad, jnp.zeros((C_pad,), jnp.float32))   # [N_pad, C_pad]
    boxes8_p = pad_rows(boxes8, N_pad, dummy8)                               # [N_pad, 8]

    onehot = (jnp.arange(C_pad, dtype=jnp.int32)[:, None]
              == tgt_ids.astype(jnp.int32)[None, :]).astype(jnp.float32)     # [C_pad, T]
    onehot_p = jnp.pad(onehot, ((0, 0), (0, T_pad - T)))                     # [C_pad, T_pad]
    tgt_t = pad_rows(tgt_boxes.astype(jnp.float32), T_pad, dummy_box).T      # [4, T_pad]
    tgt_norm_t = pad_rows(tgt_norm, T_pad, dummy_box * w_bbox).T             # [4, T_pad]

    kernel = functools.partial(_matcher_cost_kernel,
                               w_class=float(cost_class), w_giou=float(cost_giou))

    out = pl.pallas_call(
        kernel,
        out_shape=jax.ShapeDtypeStruct((N_pad, T_pad), jnp.float32),
        grid=(N_pad // tile_n, T_pad // tile_t),
        in_specs=[
            pl.BlockSpec((tile_n, C_pad), lambda i, j: (i, 0)),   # logits tile
            pl.BlockSpec((tile_n, 8), lambda i, j: (i, 0)),       # packed boxes tile
            pl.BlockSpec((C_pad, tile_t), lambda i, j: (0, j)),   # onehot target tile
            pl.BlockSpec((4, tile_t), lambda i, j: (0, j)),       # raw target boxes tile
            pl.BlockSpec((4, tile_t), lambda i, j: (0, j)),       # scaled normalized targets
        ],
        out_specs=pl.BlockSpec((tile_n, tile_t), lambda i, j: (i, j)),
        compiler_params=pltpu.CompilerParams(
            dimension_semantics=("parallel", "parallel"),
            vmem_limit_bytes=32 * 1024 * 1024),
    )(logits_p, boxes8_p, onehot_p, tgt_t, tgt_norm_t)

    return out[:N, :T]


# -------------------- host-side assignment (no Pallas eq.) ----------------- #
def _linear_sum_assignment_small(cost):
    """Exact min-cost assignment for tiny matrices (n_cols <= n_rows), matching
    scipy.optimize.linear_sum_assignment output convention (row indices sorted)."""
    n_r, n_c = cost.shape
    assert n_c <= n_r, "expected num_targets <= num_queries"
    best_rows, best_val = None, np.inf
    cols = list(range(n_c))
    for rows in itertools.permutations(range(n_r), n_c):
        val = cost[list(rows), cols].sum()
        if val < best_val:
            best_val, best_rows = val, rows
    row_ind = np.asarray(best_rows, dtype=np.int64)
    col_ind = np.arange(n_c, dtype=np.int64)
    order = np.argsort(row_ind)
    return row_ind[order], col_ind[order]


def hungarian_matcher(outputs, targets, cost_class=1.0, cost_bbox=1.0, cost_giou=1.0):
    bs, num_queries = outputs['pred_logits'].shape[:2]
    out_logits = outputs['pred_logits'].reshape(bs * num_queries, -1)
    out_bbox = outputs['pred_boxes'].reshape(bs * num_queries, 4)
    tgt_ids = jnp.concatenate([v['labels'] for v in targets])
    tgt_bbox = jnp.concatenate([v['boxes_xyxy'] for v in targets])
    image_size_out = jnp.concatenate(
        [jnp.tile(v['image_size_xyxy'][None, :], (num_queries, 1)) for v in targets])
    image_size_tgt = jnp.concatenate([v['image_size_xyxy_tgt'] for v in targets])

    C_flat = matcher_cost_matrix(out_logits, out_bbox, tgt_ids, tgt_bbox,
                                 image_size_out, image_size_tgt,
                                 cost_class, cost_bbox, cost_giou)

    # Shrink the device->host transfer: only the per-image [num_queries, s_i] sub-blocks
    # needed by the assignment are pulled to the host (not the full [N, T] matrix).
    sizes = [int(v['boxes'].shape[0]) for v in targets]
    offsets = np.concatenate([[0], np.cumsum(sizes)]).astype(np.int64)
    sub_blocks = [C_flat[i * num_queries:(i + 1) * num_queries, offsets[i]:offsets[i + 1]]
                  for i in range(bs)]
    sub_blocks = jax.device_get(sub_blocks)

    # TODO(synk): linear_sum_assignment (sequential Hungarian algorithm) has no clean
    # Pallas equivalent; solved exactly on the host with a brute-force assignment.
    indices = []
    for blk in sub_blocks:
        row, col = _linear_sum_assignment_small(np.asarray(blk))
        indices.append((row.astype(np.int64), col.astype(np.int64)))
    return indices, C_flat


# --------------- SetCriterion losses over matched pairs (plain JAX) --------------- #
def _giou_pairs(b1, b2):
    area1 = (b1[:, 2] - b1[:, 0]) * (b1[:, 3] - b1[:, 1])
    area2 = (b2[:, 2] - b2[:, 0]) * (b2[:, 3] - b2[:, 1])
    lt = jnp.maximum(b1[:, :2], b2[:, :2])
    rb = jnp.minimum(b1[:, 2:], b2[:, 2:])
    wh = jnp.maximum(rb - lt, 0.0)
    inter = wh[:, 0] * wh[:, 1]
    union = area1 + area2 - inter
    iou = inter / union
    lt_c = jnp.minimum(b1[:, :2], b2[:, :2])
    rb_c = jnp.maximum(b1[:, 2:], b2[:, 2:])
    wh_c = jnp.maximum(rb_c - lt_c, 0.0)
    area_c = wh_c[:, 0] * wh_c[:, 1]
    return iou - (area_c - union) / area_c


def set_criterion_losses(outputs, targets, indices, num_classes, eos_coef=0.1):
    """SetCriterion 'labels' (use_focal=False cross-entropy path) and 'boxes' losses.
    Tiny per-match gathers + scalar reductions -> plain JAX, not kernel-worthy.
    # TODO(synk): 'corners'/'polygons' losses need pred_corners/pred_polygons; same
    # gather + focal/L1 pattern, kept out of the Pallas path.
    """
    bs, nq, C = outputs['pred_logits'].shape
    batch_idx = np.concatenate([np.full(len(src), i, dtype=np.int64)
                                for i, (src, _) in enumerate(indices)])
    src_idx = np.concatenate([np.asarray(src) for src, _ in indices])
    num_matches = int(batch_idx.shape[0])

    # loss_labels: weighted cross-entropy, no-object class everywhere except matches.
    target_classes_o = np.concatenate(
        [np.asarray(t['labels'])[np.asarray(col)] for t, (_, col) in zip(targets, indices)])
    target_classes = np.full((bs, nq), num_classes, dtype=np.int64)
    target_classes[batch_idx, src_idx] = target_classes_o
    target_classes = jnp.asarray(target_classes)
    logp = jax.nn.log_softmax(outputs['pred_logits'].astype(jnp.float32), axis=-1)
    nll = -jnp.take_along_axis(logp, target_classes[..., None], axis=-1)[..., 0]
    empty_weight = jnp.ones((num_classes + 1,), jnp.float32).at[-1].set(eos_coef)
    w = empty_weight[target_classes]
    loss_ce = jnp.sum(w * nll) / jnp.sum(w)

    # loss_boxes: L1 on size-normalized boxes + GIoU over matched pairs.
    src_boxes = outputs['pred_boxes'][jnp.asarray(batch_idx), jnp.asarray(src_idx)]
    tgt_boxes = jnp.concatenate(
        [t['boxes_xyxy'][jnp.asarray(col)] for t, (_, col) in zip(targets, indices)], axis=0)
    image_size = jnp.concatenate([t['image_size_xyxy_tgt'] for t in targets], axis=0)
    loss_giou = jnp.sum(1.0 - _giou_pairs(src_boxes, tgt_boxes)) / num_matches
    loss_bbox = jnp.sum(jnp.abs(src_boxes / image_size - tgt_boxes / image_size)) / num_matches
    return {'loss_ce': loss_ce, 'loss_bbox': loss_bbox, 'loss_giou': loss_giou}


# ----------------------------- pure-JAX reference -------------------------- #
def _generalized_box_iou_ref(boxes1, boxes2):
    area1 = (boxes1[:, 2] - boxes1[:, 0]) * (boxes1[:, 3] - boxes1[:, 1])
    area2 = (boxes2[:, 2] - boxes2[:, 0]) * (boxes2[:, 3] - boxes2[:, 1])
    lt = jnp.maximum(boxes1[:, None, :2], boxes2[None, :, :2])
    rb = jnp.minimum(boxes1[:, None, 2:], boxes2[None, :, 2:])
    wh = jnp.maximum(rb - lt, 0.0)
    inter = wh[..., 0] * wh[..., 1]
    union = area1[:, None] + area2[None, :] - inter
    iou = inter / union
    lt_c = jnp.minimum(boxes1[:, None, :2], boxes2[None, :, :2])
    rb_c = jnp.maximum(boxes1[:, None, 2:], boxes2[None, :, 2:])
    wh_c = jnp.maximum(rb_c - lt_c, 0.0)
    area_c = wh_c[..., 0] * wh_c[..., 1]
    return iou - (area_c - union) / area_c


def reference_cost(outputs, targets, cost_class=1.0, cost_bbox=1.0, cost_giou=1.0):
    bs, nq = outputs['pred_logits'].shape[:2]
    out_prob = jax.nn.softmax(outputs['pred_logits'].reshape(bs * nq, -1), axis=-1)
    out_bbox = outputs['pred_boxes'].reshape(bs * nq, 4)
    tgt_ids = jnp.concatenate([v['labels'] for v in targets])
    tgt_bbox = jnp.concatenate([v['boxes_xyxy'] for v in targets])
    cost_class_m = -out_prob[:, tgt_ids]
    image_size_out = jnp.concatenate(
        [jnp.tile(v['image_size_xyxy'][None, :], (nq, 1)) for v in targets])
    image_size_tgt = jnp.concatenate([v['image_size_xyxy_tgt'] for v in targets])
    ob = out_bbox / image_size_out
    tb = tgt_bbox / image_size_tgt
    cost_bbox_m = jnp.sum(jnp.abs(ob[:, None, :] - tb[None, :, :]), axis=-1)
    cost_giou_m = -_generalized_box_iou_ref(out_bbox, tgt_bbox)
    return cost_bbox * cost_bbox_m + cost_class * cost_class_m + cost_giou * cost_giou_m


# ---------------------------------- main ----------------------------------- #
if __name__ == "__main__":
    key = jax.random.PRNGKey(0)
    bs, num_queries = 2, 8
    num_fg_classes = 7                      # SetCriterion num_classes (no-object omitted)
    num_logits = num_fg_classes + 1         # logits channels for the CE (use_focal=False) path
    sizes = [3, 5]
    img_whs = [(640.0, 480.0), (800.0, 600.0)]

    k_logits, k_pb, k_tb, k_lab = jax.random.split(key, 4)

    def rand_xyxy(k, n, w, h):
        ka, kb = jax.random.split(k)
        wh = jnp.array([w, h], jnp.float32)
        cxcy = jax.random.uniform(ka, (n, 2), jnp.float32) * wh * 0.8 + wh * 0.1
        box_wh = jax.random.uniform(kb, (n, 2), jnp.float32) * wh * 0.2 + 4.0
        return jnp.concatenate([cxcy - box_wh / 2.0, cxcy + box_wh / 2.0], axis=-1)

    pred_logits = jax.random.normal(k_logits, (bs, num_queries, num_logits), jnp.float32)
    pb_keys = jax.random.split(k_pb, bs)
    pred_boxes = jnp.stack([rand_xyxy(pb_keys[b], num_queries, *img_whs[b]) for b in range(bs)])

    tb_keys = jax.random.split(k_tb, bs)
    lab_keys = jax.random.split(k_lab, bs)
    targets = []
    for b in range(bs):
        w, h = img_whs[b]
        n = sizes[b]
        boxes = rand_xyxy(tb_keys[b], n, w, h)
        labels = jax.random.randint(lab_keys[b], (n,), 0, num_fg_classes)
        isz = jnp.array([w, h, w, h], jnp.float32)
        targets.append({
            'labels': labels,
            'boxes': boxes,
            'boxes_xyxy': boxes,
            'image_size_xyxy': isz,
            'image_size_xyxy_tgt': jnp.tile(isz[None, :], (n, 1)),
        })

    outputs = {'pred_logits': pred_logits, 'pred_boxes': pred_boxes}

    # 1) Hungarian matching driven by the Pallas cost-matrix kernel
    indices, C_kernel = hungarian_matcher(outputs, targets)
    C_ref = reference_cost(outputs, targets)
    np.testing.assert_allclose(np.asarray(C_kernel), np.asarray(C_ref),
                               rtol=1e-5, atol=1e-5)

    # 2) SetCriterion losses over the matched pairs (plain JAX)
    losses = set_criterion_losses(outputs, targets, indices,
                                  num_classes=num_fg_classes, eos_coef=0.1)
    jax.block_until_ready((C_kernel, losses['loss_ce'], losses['loss_bbox'],
                           losses['loss_giou']))
    print("KERNEL_OK")
</pallas_src>

<mosaic_0001>
module attributes {stable_mosaic.version = 11 : i64} {
  func.func @_matcher_cost_kernel(%arg0: i32, %arg1: i32, %arg2: memref<8x128xf32, #tpu.memory_space<vmem>>, %arg3: memref<8x8xf32, #tpu.memory_space<vmem>>, %arg4: memref<128x128xf32, #tpu.memory_space<vmem>>, %arg5: memref<4x128xf32, #tpu.memory_space<vmem>>, %arg6: memref<4x128xf32, #tpu.memory_space<vmem>>, %arg7: memref<8x128xf32, #tpu.memory_space<vmem>>) attributes {dimension_semantics = [#tpu.dimension_semantics<parallel>, #tpu.dimension_semantics<parallel>], iteration_bounds = array<i64: 2, 1>, scalar_prefetch = 0 : i64, scratch_operands = 0 : i64, tpu.core_type = #tpu.core_type<tc>, window_params = [{transform_indices = @transform_0, window_bounds = array<i64: 8, 128>}, {transform_indices = @transform_1, window_bounds = array<i64: 8, 8>}, {transform_indices = @transform_2, window_bounds = array<i64: 128, 128>}, {transform_indices = @transform_3, window_bounds = array<i64: 4, 128>}, {transform_indices = @transform_4, window_bounds = array<i64: 4, 128>}, {transform_indices = @transform_5, window_bounds = array<i64: 8, 128>}]} {
    %c0 = arith.constant 0 : index
    %c0_0 = arith.constant 0 : index
    %0 = vector.load %arg2[%c0, %c0_0] : memref<8x128xf32, #tpu.memory_space<vmem>>, vector<8x128xf32>
    %cst = arith.constant dense<0xFF800000> : vector<8xf32>
    %1 = vector.multi_reduction <maximumf>, %0, %cst [1] : vector<8x128xf32> to vector<8xf32>
    %2 = vector.shape_cast %1 : vector<8xf32> to vector<8x1xf32>
    %3 = vector.broadcast %2 : vector<8x1xf32> to vector<8x128xf32>
    %4 = arith.subf %0, %3 : vector<8x128xf32>
    %5 = math.exp %4 : vector<8x128xf32>
    %cst_1 = arith.constant dense<0.000000e+00> : vector<8xf32>
    %6 = vector.multi_reduction <add>, %5, %cst_1 [1] : vector<8x128xf32> to vector<8xf32>
    %7 = vector.shape_cast %6 : vector<8xf32> to vector<8x1xf32>
    %8 = tpu.reciprocal %7 : vector<8x1xf32> -> vector<8x1xf32>
    %cst_2 = arith.constant -1.000000e+00 : f32
    %9 = vector.broadcast %cst_2 : f32 to vector<8x1xf32>
    %10 = arith.mulf %8, %9 : vector<8x1xf32>
    %c0_3 = arith.constant 0 : index
    %c0_4 = arith.constant 0 : index
    %11 = vector.load %arg4[%c0_3, %c0_4] : memref<128x128xf32, #tpu.memory_space<vmem>>, vector<128x128xf32>
    %cst_5 = arith.constant dense<0.000000e+00> : vector<8x128xf32>
    %12 = tpu.matmul %5, %11, %cst_5 {dimension_numbers = #tpu.dot_dimension_numbers<[1], [0], [0], [1], [0, 0, 1, 1], [], []>, precision = #tpu.contract_precision<fp32>} : vector<8x128xf32>, vector<128x128xf32>, vector<8x128xf32> -> vector<8x128xf32>
    %13 = vector.broadcast %10 : vector<8x1xf32> to vector<8x128xf32>
    %14 = arith.mulf %12, %13 : vector<8x128xf32>
    %c0_6 = arith.constant 0 : index
    %c0_7 = arith.constant 0 : index
    %15 = vector.load %arg3[%c0_6, %c0_7] : memref<8x8xf32, #tpu.memory_space<vmem>>, vector<8x8xf32>
    %c0_8 = arith.constant 0 : index
    %c0_9 = arith.constant 0 : index
    %16 = vector.load %arg5[%c0_8, %c0_9] : memref<4x128xf32, #tpu.memory_space<vmem>>, vector<4x128xf32>
    %c0_10 = arith.constant 0 : index
    %c0_11 = arith.constant 0 : index
    %17 = vector.load %arg6[%c0_10, %c0_11] : memref<4x128xf32, #tpu.memory_space<vmem>>, vector<4x128xf32>
    %18 = vector.extract_strided_slice %15 {offsets = [0, 4], sizes = [8, 1], strides = [1, 1]} : vector<8x8xf32> to vector<8x1xf32>
    %19 = vector.extract_strided_slice %17 {offsets = [0, 0], sizes = [1, 128], strides = [1, 1]} : vector<4x128xf32> to vector<1x128xf32>
    %20 = vector.broadcast %18 : vector<8x1xf32> to vector<8x128xf32>
    %21 = vector.broadcast %19 : vector<1x128xf32> to vector<8x128xf32>
    %22 = arith.subf %20, %21 : vector<8x128xf32>
    %23 = math.absf %22 : vector<8x128xf32>
    %24 = arith.addf %14, %23 : vector<8x128xf32>
    %25 = vector.extract_strided_slice %15 {offsets = [0, 5], sizes = [8, 1], strides = [1, 1]} : vector<8x8xf32> to vector<8x1xf32>
    %26 = vector.extract_strided_slice %17 {offsets = [1, 0], sizes = [1, 128], strides = [1, 1]} : vector<4x128xf32> to vector<1x128xf32>
    %27 = vector.broadcast %25 : vector<8x1xf32> to vector<8x128xf32>
    %28 = vector.broadcast %26 : vector<1x128xf32> to vector<8x128xf32>
    %29 = arith.subf %27, %28 : vector<8x128xf32>
    %30 = math.absf %29 : vector<8x128xf32>
    %31 = arith.addf %24, %30 : vector<8x128xf32>
    %32 = vector.extract_strided_slice %15 {offsets = [0, 6], sizes = [8, 1], strides = [1, 1]} : vector<8x8xf32> to vector<8x1xf32>
    %33 = vector.extract_strided_slice %17 {offsets = [2, 0], sizes = [1, 128], strides = [1, 1]} : vector<4x128xf32> to vector<1x128xf32>
    %34 = vector.broadcast %32 : vector<8x1xf32> to vector<8x128xf32>
    %35 = vector.broadcast %33 : vector<1x128xf32> to vector<8x128xf32>
    %36 = arith.subf %34, %35 : vector<8x128xf32>
    %37 = math.absf %36 : vector<8x128xf32>
    %38 = arith.addf %31, %37 : vector<8x128xf32>
    %39 = vector.extract_strided_slice %15 {offsets = [0, 7], sizes = [8, 1], strides = [1, 1]} : vector<8x8xf32> to vector<8x1xf32>
    %40 = vector.extract_strided_slice %17 {offsets = [3, 0], sizes = [1, 128], strides = [1, 1]} : vector<4x128xf32> to vector<1x128xf32>
    %41 = vector.broadcast %39 : vector<8x1xf32> to vector<8x128xf32>
    %42 = vector.broadcast %40 : vector<1x128xf32> to vector<8x128xf32>
    %43 = arith.subf %41, %42 : vector<8x128xf32>
    %44 = math.absf %43 : vector<8x128xf32>
    %45 = arith.addf %38, %44 : vector<8x128xf32>
    %46 = vector.extract_strided_slice %15 {offsets = [0, 0], sizes = [8, 1], strides = [1, 1]} : vector<8x8xf32> to vector<8x1xf32>
    %47 = vector.extract_strided_slice %15 {offsets = [0, 1], sizes = [8, 1], strides = [1, 1]} : vector<8x8xf32> to vector<8x1xf32>
    %48 = vector.extract_strided_slice %15 {offsets = [0, 2], sizes = [8, 1], strides = [1, 1]} : vector<8x8xf32> to vector<8x1xf32>
    %49 = vector.extract_strided_slice %15 {offsets = [0, 3], sizes = [8, 1], strides = [1, 1]} : vector<8x8xf32> to vector<8x1xf32>
    %50 = vector.extract_strided_slice %16 {offsets = [0, 0], sizes = [1, 128], strides = [1, 1]} : vector<4x128xf32> to vector<1x128xf32>
    %51 = vector.extract_strided_slice %16 {offsets = [1, 0], sizes = [1, 128], strides = [1, 1]} : vector<4x128xf32> to vector<1x128xf32>
    %52 = vector.extract_strided_slice %16 {offsets = [2, 0], sizes = [1, 128], strides = [1, 1]} : vector<4x128xf32> to vector<1x128xf32>
    %53 = vector.extract_strided_slice %16 {offsets = [3, 0], sizes = [1, 128], strides = [1, 1]} : vector<4x128xf32> to vector<1x128xf32>
    %54 = arith.subf %48, %46 : vector<8x1xf32>
    %55 = arith.subf %49, %47 : vector<8x1xf32>
    %56 = arith.mulf %54, %55 : vector<8x1xf32>
    %57 = arith.subf %52, %50 : vector<1x128xf32>
    %58 = arith.subf %53, %51 : vector<1x128xf32>
    %59 = arith.mulf %57, %58 : vector<1x128xf32>
    %60 = vector.broadcast %48 : vector<8x1xf32> to vector<8x128xf32>
    %61 = vector.broadcast %52 : vector<1x128xf32> to vector<8x128xf32>
    %62 = arith.minimumf %60, %61 : vector<8x128xf32>
    %63 = vector.broadcast %46 : vector<8x1xf32> to vector<8x128xf32>
    %64 = vector.broadcast %50 : vector<1x128xf32> to vector<8x128xf32>
    %65 = arith.maximumf %63, %64 : vector<8x128xf32>
    %66 = arith.subf %62, %65 : vector<8x128xf32>
    %cst_12 = arith.constant 0.000000e+00 : f32
    %67 = vector.broadcast %cst_12 : f32 to vector<8x128xf32>
    %68 = arith.maximumf %66, %67 : vector<8x128xf32>
    %69 = vector.broadcast %49 : vector<8x1xf32> to vector<8x128xf32>
    %70 = vector.broadcast %53 : vector<1x128xf32> to vector<8x128xf32>
    %71 = arith.minimumf %69, %70 : vector<8x128xf32>
    %72 = vector.broadcast %47 : vector<8x1xf32> to vector<8x128xf32>
    %73 = vector.broadcast %51 : vector<1x128xf32> to vector<8x128xf32>
    %74 = arith.maximumf %72, %73 : vector<8x128xf32>
    %75 = arith.subf %71, %74 : vector<8x128xf32>
    %cst_13 = arith.constant 0.000000e+00 : f32
    %76 = vector.broadcast %cst_13 : f32 to vector<8x128xf32>
    %77 = arith.maximumf %75, %76 : vector<8x128xf32>
    %78 = arith.mulf %68, %77 : vector<8x128xf32>
    %79 = vector.broadcast %56 : vector<8x1xf32> to vector<8x128xf32>
    %80 = vector.broadcast %59 : vector<1x128xf32> to vector<8x128xf32>
    %81 = arith.addf %79, %80 : vector<8x128xf32>
    %82 = arith.subf %81, %78 : vector<8x128xf32>
    %83 = vector.broadcast %48 : vector<8x1xf32> to vector<8x128xf32>
    %84 = vector.broadcast %52 : vector<1x128xf32> to vector<8x128xf32>
    %85 = arith.maximumf %83, %84 : vector<8x128xf32>
    %86 = vector.broadcast %46 : vector<8x1xf32> to vector<8x128xf32>
    %87 = vector.broadcast %50 : vector<1x128xf32> to vector<8x128xf32>
    %88 = arith.minimumf %86, %87 : vector<8x128xf32>
    %89 = arith.subf %85, %88 : vector<8x128xf32>
    %cst_14 = arith.constant 0.000000e+00 : f32
    %90 = vector.broadcast %cst_14 : f32 to vector<8x128xf32>
    %91 = arith.maximumf %89, %90 : vector<8x128xf32>
    %92 = vector.broadcast %49 : vector<8x1xf32> to vector<8x128xf32>
    %93 = vector.broadcast %53 : vector<1x128xf32> to vector<8x128xf32>
    %94 = arith.maximumf %92, %93 : vector<8x128xf32>
    %95 = vector.broadcast %47 : vector<8x1xf32> to vector<8x128xf32>
    %96 = vector.broadcast %51 : vector<1x128xf32> to vector<8x128xf32>
    %97 = arith.minimumf %95, %96 : vector<8x128xf32>
    %98 = arith.subf %94, %97 : vector<8x128xf32>
    %cst_15 = arith.constant 0.000000e+00 : f32
    %99 = vector.broadcast %cst_15 : f32 to vector<8x128xf32>
    %100 = arith.maximumf %98, %99 : vector<8x128xf32>
    %101 = arith.mulf %91, %100 : vector<8x128xf32>
    %102 = tpu.reciprocal %82 : vector<8x128xf32> -> vector<8x128xf32>
    %103 = arith.mulf %78, %102 : vector<8x128xf32>
    %104 = tpu.reciprocal %101 : vector<8x128xf32> -> vector<8x128xf32>
    %105 = arith.mulf %82, %104 : vector<8x128xf32>
    %106 = arith.addf %103, %105 : vector<8x128xf32>
    %cst_16 = arith.constant 1.000000e+00 : f32
    %107 = vector.broadcast %cst_16 : f32 to vector<8x128xf32>
    %108 = arith.subf %107, %106 : vector<8x128xf32>
    %cst_17 = arith.constant 1.000000e+00 : f32
    %109 = vector.broadcast %cst_17 : f32 to vector<8x128xf32>
    %110 = arith.mulf %109, %108 : vector<8x128xf32>
    %111 = arith.addf %45, %110 : vector<8x128xf32>
    %c0_18 = arith.constant 0 : index
    %c0_19 = arith.constant 0 : index
    %112 = vector.load %arg7[%c0_18, %c0_19] : memref<8x128xf32, #tpu.memory_space<vmem>>, vector<8x128xf32>
    tpu.vector_store %arg7[%c0_18, %c0_19], %111 {strides = array<i32>} : memref<8x128xf32, #tpu.memory_space<vmem>>, vector<8x128xf32>,
    return
  }
  func.func @transform_0(%arg0: i32, %arg1: i32) -> (i32, i32) {
    %c0_i32 = arith.constant 0 : i32
    %c0_i32_0 = arith.constant 0 : i32
    return %arg0, %c0_i32 : i32, i32
  }
  func.func @transform_1(%arg0: i32, %arg1: i32) -> (i32, i32) {
    %c0_i32 = arith.constant 0 : i32
    %c0_i32_0 = arith.constant 0 : i32
    return %arg0, %c0_i32 : i32, i32
  }
  func.func @transform_2(%arg0: i32, %arg1: i32) -> (i32, i32) {
    %c0_i32 = arith.constant 0 : i32
    %c0_i32_0 = arith.constant 0 : i32
    return %c0_i32, %arg1 : i32, i32
  }
  func.func @transform_3(%arg0: i32, %arg1: i32) -> (i32, i32) {
    %c0_i32 = arith.constant 0 : i32
    %c0_i32_0 = arith.constant 0 : i32
    return %c0_i32, %arg1 : i32, i32
  }
  func.func @transform_4(%arg0: i32, %arg1: i32) -> (i32, i32) {
    %c0_i32 = arith.constant 0 : i32
    %c0_i32_0 = arith.constant 0 : i32
    return %c0_i32, %arg1 : i32, i32
  }
  func.func @transform_5(%arg0: i32, %arg1: i32) -> (i32, i32) {
    %c0_i32 = arith.constant 0 : i32
    return %arg0, %arg1 : i32, i32
  }
}

</mosaic_0001>

<bundles_post_ra>
// kernel: tpu_custom_call.1
= control target key start
LH: loop header
LB: loop body
LE: loop exit
PB: predicated region body
PF: predicated region fallthrough
CT: control target
= control target key end

     0   :  { %10 = vsyncpa [#allocation3], 0  ;;  %s2439_s0 = inlined_call_operand.vmem [shape: f32[16,128], index: 0, kind: input, shape index: {}]   ;;  %s2440_s1 = inlined_call_operand.vmem [shape: f32[16,8], index: 1, kind: input, shape index: {}]   ;;  %s2441_s2 = inlined_call_operand.hbm [shape: f32[128,128], index: 2, kind: input, shape index: {}]   ;;  %s2442_s3 = inlined_call_operand.vmem [shape: f32[4,128], index: 3, kind: input, shape index: {}]   ;;  %s2443_s4 = inlined_call_operand.vmem [shape: f32[4,128], index: 4, kind: input, shape index: {}]   ;;  %s2444_s5 = inlined_call_operand.hbm [shape: f32[16,128], index: 5, kind: output, shape index: {}]  }
   0x1   :  { %11 = vsyncpa [#allocation4], 0 }
   0x2   :  { %13 = vsyncpa [#allocation4 + $0x1], 0  ;;  %s1987_s18 = smov 0   ;;  %s1989_s19 = smov 0  }
   0x3   :  { %s1991_s20 = smov 0   ;;  %s1993_s21 = smov 0  }
   0x4   :  { %s1995_s22 = smov 0   ;;  %s1997_s23 = smov 0  }
   0x5 LB: > { %s1248_s24 = sadd.s32 4294967295, %s1938_s23   ;;  %s1249_s25 = sadd.s32 4294967294, %s1938_s23   ;;  %s1938_s23 = sphi %s1997_s23, %s19_s23   ;;  %s1934_s22 = sphi %s1995_s22, %s2462_s22   ;;  %s1930_s21 = sphi %s1993_s21, %s2461_s21   ;;  %s1926_s20 = sphi %s1991_s20, %s2460_s20   ;;  %s1922_s19 = sphi %s1989_s19, %s2459_s19   ;;  %s1918_s18 = sphi %s1987_s18, %s2458_s18  }
   0x6   : > { %s31_s26 = sadd.s32 1, %s1934_s22  ;;  %s170_s27 = sadd.s32 1, %s1926_s20 }
   0x7   : > { %p33_p0 = scmp.ge.s32.totalorder %s31_s26, 2  ;;  %p180_p1 = scmp.ne.s32.totalorder %s1926_s20, %s1922_s19 }
   0x8   : > { %p181_p2 = scmp.eq.s32.totalorder %s1248_s24, 1  ;;  %p186_p3 = scmp.ne.s32.totalorder %s1922_s19, %s1918_s18 }
   0x9   : > { %s2464_s26 = smov (%p33_p0, %s31_s26), 0  ;;  %p187_p5 = scmp.eq.s32.totalorder %s1249_s25, 1 }
   0xa   : > { %p2027_p4 = por %p181_p2, %p180_p1  ;;  %s165_s29 = ssub.s32 %s1934_s22, %s2464_s26 }
   0xb   : > { %p1250_p6 = scmp.ge.s32.totalorder %s1938_s23, 1  ;;  %p168_p7 = scmp.eq.s32.totalorder %s165_s29, 0 }
   0xc   : > { %s2449_s28 = scalar_select %p2027_p4, 1, 0 }
   0xd   : > { %p2034_p8 = por %p187_p5, %p186_p3  ;;  %p194_p9 = scmp.lt.s32.totalorder %s1938_s23, 3 }
   0xe   : > { %s2040_s6 = scalar_select %p168_p7, %s1926_s20, %s170_s27  }
   0xf   : > { %s2450_s30 = scalar_select %p2034_p8, 1, 0 }
  0x10   : > { %p2042_p10 = pnand %p1250_p6, %p194_p9  ;;  %p2046_p11 = scmp.eq.s32.totalorder %s1248_s24, 0 }
  0x11   : > { %s1940_s9 = smov [#allocation2]   ;;  %s1828_s14 = scalar_lea.hbm %s2441_s2, 2048 }
  0x12   : > { %s2451_s7 = scalar_select %p2042_p10, 1, 0 }
  0x13   : > { %s2452_s8 = scalar_select %p2046_p11, 1, 0 }
  0x14   : > { %p1735_p12 = pneg %p2042_p10  ;;  %s208_s10 = sshll.u32 %s1940_s9, 4  ;;  %s209_s10 = int_to_ptr.vmem [resolvable:$true] %s208_s10 }
  0x15   : > { %p1829_p0 = scmp.ne.s32.totalorder %s2441_s2, %s1828_s14  ;;  %p1835_p5 = scmp.lt.u32.totalorder %s1828_s14, %s2441_s2 }
  0x16   : > { %p2054_p13 = pnand %p2046_p11, %p1735_p12 }
  0x18   : > { %p1830_p1 = pneg %p2054_p13 }
  0x1a   : > { %p1831_p2 = pnand %p1830_p1, %p1829_p0 }
  0x1c   : > { %p1832_p3 = pneg %p1831_p2 }
  0x1e   : > { %p1837_p6 = pnand %p1835_p5, %p1832_p3 }
  0x20   : > { %1840 = shalt.err (!%p1837_p6)
}
  0x21   : > { %s1841_s25 = scalar_lea.vmem %s209_s10, 2048  ;;  %p1849_p8 = scmp.lt.s32.totalorder %s209_s10, %s209_s10 }
  0x22   : > { %p1842_p7 = scmp.ne.s32.totalorder %s209_s10, %s1841_s25  ;;  %p1850_p4 = scmp.lt.s32.totalorder %s1841_s25, %s1841_s25 }
  0x24   : > { %p1844_p9 = pnand %p1842_p7, %p1830_p1  ;;  %p1851_p11 = por %p1850_p4, %p1849_p8 }
  0x26   : > { %p1845_p12 = pneg %p1844_p9 }
  0x28   : > { %p1852_p10 = pnand %p1851_p11, %p1845_p12 }
  0x2a   : > { %1855 = shalt.err (!%p1852_p10)
}
  0x2b   : > { %s1941_s27 = smov 128   ;;  %s1942_s29 = smov 8  }
  0x2c   : > { %1738 = dma.hbm_to_vmem [thread:$0]  (!%p2054_p13), %s2441_s2, 2048, %s209_s10, [#allocation3], %s1941_s27, %s1941_s27, %s1942_s29  }
  0x2d   : > { %p2454_p0 = scmp.ne.s32.totalorder %s2451_s7, 0 }
  0x2e   : > { %p2455_p2 = scmp.ne.s32.totalorder (!%p2454_p0), %s2452_s8, 0 }
  0x2f   : > { %252 = sbr.rel (%p2454_p0) target bundleno = 533 (0x215), region = 40 }
  0x36   : > { %1909 = dma.done.wait (%p2455_p2), [#allocation3], 2048  }
  0x37   : > { %1911 = vsyncadd (%p2455_p2), [#allocation3], 4294965248  ;;  %p291_p4 = scmp.lt.s32.totalorder %s1930_s21, 1  ;;  %v1943_v0 = vmov 0.0|0.0   ;;  %v317_v2 = vld [vmem:[#allocation2] sm:$0xff]  ;;  %v318_v3 = vld [vmem:[#allocation2 + $0x8] sm:$0xff] }
  0x38   : > { %1648 = vmatprep.subr.bf16.mxu0 %v1943_v0  ;;  %1576 = vmatprep.subr.bf16.mxu1 %v1943_v0  ;;  %v334_v4 = vand.u32 4294901760, %v317_v2  ;;  %v319_v5 = vld [vmem:[#allocation2 + $0x10] sm:$0xff]  ;;  %v320_v6 = vld [vmem:[#allocation2 + $0x18] sm:$0xff]  ;;  %v337_v7 = vand.u32 4294901760, %v318_v3  ;;  %v321_v10 = vld [vmem:[#allocation2 + $0x20] sm:$0xff]  ;;  %v1944_v42 = vmov 3  }
  0x39   : > { %s2084_s11 = scalar_select %p291_p4, %s1930_s21, 1  ;;  %v340_v8 = vand.u32 4294901760, %v319_v5  ;;  %v343_v9 = vand.u32 4294901760, %v320_v6  ;;  %v322_v11 = vld [vmem:[#allocation2 + $0x28] sm:$0xff]  ;;  %v346_v13 = vand.u32 4294901760, %v321_v10  ;;  %v323_v23 = vld [vmem:[#allocation2 + $0x30] sm:$0xff]  ;;  %1812 = vset.pattern.permute.xlu1 %v1944_v42 }
  0x3a   : > { %v2095_v12 = vsub.f32 %v317_v2, %v334_v4  ;;  %v349_v14 = vand.u32 4294901760, %v322_v11  ;;  %v2097_v15 = vpack.c.bf16 %v337_v7, %v334_v4  ;;  %v2099_v16 = vsub.f32 %v318_v3, %v337_v7  ;;  %v324_v24 = vld [vmem:[#allocation2 + $0x38] sm:$0xff]  ;;  %v325_v28 = vld [vmem:[#allocation2 + $0x40] sm:$0xff]  ;;  %v326_v29 = vld [vmem:[#allocation2 + $0x48] sm:$0xff]  ;;  %s1945_s17 = smov 2   ;;  %s1951_s24 = smov 127  }
  0x3b   : > { %s1258_s7 = sshll.u32 %s2084_s11, 3  ;;  %v2101_v17 = vsub.f32 %v319_v5, %v340_v8  ;;  %v2103_v18 = vsub.f32 %v320_v6, %v343_v9  ;;  %v2105_v19 = vsub.f32 %v321_v10, %v346_v13  ;;  %v2111_v21 = vpack.c.bf16 %v343_v9, %v340_v8  ;;  %v327_v37 = vld [vmem:[#allocation2 + $0x50] sm:$0xff]  ;;  %v328_v38 = vld [vmem:[#allocation2 + $0x58] sm:$0xff]  ;;  %v329_v46 = vld [vmem:[#allocation2 + $0x60] sm:$0xff]  ;;  %s288_s12 = sand.u32 1, %s1922_s19  }
  0x3c   : > { %s294_s14 = scalar_lea.vmem %s2439_s0, %s1258_s7  ;;  %v2107_v20 = vsub.f32 %v322_v11, %v349_v14  ;;  %1650 = vmatpush3.bf16.msra.mxu0 %v2097_v15  ;;  %1578 = vmatpush3.bf16.msra.mxu1 %v2097_v15  ;;  %v2117_v22 = vpack.c.bf16 %v349_v14, %v346_v13  ;;  %v352_v25 = vand.u32 4294901760, %v323_v23  ;;  %v355_v26 = vand.u32 4294901760, %v324_v24  ;;  %s298_s16 = scalar_lea.vmem %s2440_s1, %s1258_s7  ;;  %v330_v47 = vld [vmem:[#allocation2 + $0x68] sm:$0xff]  ;;  %v331_v50 = vld [vmem:[#allocation2 + $0x70] sm:$0xff]  ;;  %v332_v51 = vld [vmem:[#allocation2 + $0x78] sm:$0xff] }
  0x3d   : > { %v2092_v1 = vld [vmem:[%s294_s14] sm:$0xff]  ;;  %1651 = vmatprep.subr.bf16.mxu0 %v1943_v0  ;;  %1579 = vmatprep.subr.bf16.mxu1 %v1943_v0  ;;  %v358_v30 = vand.u32 4294901760, %v325_v28  ;;  %v361_v31 = vand.u32 4294901760, %v326_v29  ;;  %v364_v40 = vand.u32 4294901760, %v327_v37  ;;  %v367_v41 = vand.u32 4294901760, %v328_v38  ;;  %s1257_s11 = sshll.u32 %s288_s12, 3 }
  0x3e   : > { %308 = vmax.xlane.f32.xlu0 %v2092_v1  ;;  %v2123_v27 = vpack.c.bf16 %v355_v26, %v352_v25  ;;  %v2136_v33 = vsub.f32 %v323_v23, %v352_v25  ;;  %v2138_v34 = vsub.f32 %v324_v24, %v355_v26  ;;  %v2145_v39 = vld [vmem:[%s298_s16] sm:$0xff]  ;;  %v370_v48 = vand.u32 4294901760, %v329_v46  ;;  %s1261_s7 = sshll.u32 %s1930_s21, 7  ;;  %s290_s10 = scalar_lea.vmem [#allocation5], %s1257_s11 }
  0x3f   : > { %v2134_v32 = vpack.c.bf16 %v361_v31, %v358_v30  ;;  %v2141_v35 = vsub.f32 %v325_v28, %v358_v30  ;;  %v2143_v36 = vsub.f32 %v326_v29, %v361_v31  ;;  %v2149_v43 = vpack.c.bf16 %v367_v41, %v364_v40  ;;  %s1124_s13 = sshll.u32 %s290_s10, 4  ;;  %s2392_s15 = scalar_lea.hbm %s2444_s5, %s1261_s7  ;;  %s2394_s13 = int_to_ptr.vmem [resolvable:$true] %s1124_s13 }
  0x40   : > { %1653 = vmatpush3.bf16.msra.mxu0 %v2111_v21  ;;  %1581 = vmatpush3.bf16.msra.mxu1 %v2111_v21  ;;  %v2151_v44 = vsub.f32 %v327_v37, %v364_v40  ;;  %v2153_v45 = vsub.f32 %v328_v38, %v367_v41  ;;  %v373_v49 = vand.u32 4294901760, %v330_v47  ;;  %v2162_v53 = vsub.f32 %v329_v46, %v370_v48  ;;  %s1110_s16 = scalar_lea.sflag [#allocation4], %s288_s12  ;;  %p2456_p10 = scmp.ne.s32.totalorder %s2449_s28, 0 }
  0x41   : > { %1654 = vmatprep.subr.bf16.mxu0 %v1943_v0  ;;  %1582 = vmatprep.subr.bf16.mxu1 %v1943_v0  ;;  %v376_v55 = vand.u32 4294901760, %v331_v50  ;;  %vm1946_vm0 = vmmov 0   ;;  %v1947_v56 = vmov 0.0   ;;  %v379_v57 = vand.u32 4294901760, %v332_v51  ;;  %s1956_s21 = smov [#allocation5]  }
  0x42   : > { %v2160_v52 = vpack.c.bf16 %v373_v49, %v370_v48  ;;  %v2164_v54 = vsub.f32 %v330_v47, %v373_v49  ;;  %1503 = vmatprep.mubr.msk.f32.mxu0 %vm1946_vm0, %v1947_v56  ;;  %1398 = vmatprep.mubr.msk.f32.mxu1 %vm1946_vm0, %v1947_v56  ;;  %v427_v61 = vand.u32 4294901760, %v2095_v12  ;;  %v434_v62 = vand.u32 4294901760, %v2099_v16 }
  0x43   : > { %v2172_v58 = vsub.f32 %v331_v50, %v376_v55  ;;  %v2175_v59 = vsub.f32 %v332_v51, %v379_v57  ;;  %v2178_v60 = vpack.c.bf16 %v379_v57, %v376_v55  ;;  %v441_v6 = vand.u32 4294901760, %v2101_v17 }
  0x44   : > { %1656 = vmatpush3.bf16.msra.mxu0 %v2117_v22  ;;  %1584 = vmatpush3.bf16.msra.mxu1 %v2117_v22  ;;  %v2186_v63 = vpack.c.bf16 %v434_v62, %v427_v61  ;;  %v428_v2 = vsub.f32 %v2095_v12, %v427_v61  ;;  %v435_v3 = vsub.f32 %v2099_v16, %v434_v62  ;;  %v448_v7 = vand.u32 4294901760, %v2103_v18 }
  0x45   : > { %1657 = vmatprep.subr.bf16.mxu0 %v1943_v0  ;;  %1585 = vmatprep.subr.bf16.mxu1 %v1943_v0  ;;  %v442_v10 = vsub.f32 %v2101_v17, %v441_v6  ;;  %v455_v23 = vand.u32 4294901760, %v2105_v19  ;;  %v462_v24 = vand.u32 4294901760, %v2107_v20  ;;  %v469_v37 = vand.u32 4294901760, %v2136_v33 }
  0x46   : > { %v429_v4 = vand.u32 4294901760, %v428_v2  ;;  %v436_v5 = vand.u32 4294901760, %v435_v3  ;;  %v2197_v9 = vpack.c.bf16 %v448_v7, %v441_v6  ;;  %v449_v11 = vsub.f32 %v2103_v18, %v448_v7 }
  0x47   : > { %v443_v13 = vand.u32 4294901760, %v442_v10  ;;  %v2205_v26 = vpack.c.bf16 %v462_v24, %v455_v23  ;;  %v456_v28 = vsub.f32 %v2105_v19, %v455_v23  ;;  %v463_v29 = vsub.f32 %v2107_v20, %v462_v24 }
  0x48   : > { %1659 = vmatpush3.bf16.msra.mxu0 %v2123_v27  ;;  %1587 = vmatpush3.bf16.msra.mxu1 %v2123_v27  ;;  %v2195_v8 = vpack.c.bf16 %v436_v5, %v429_v4  ;;  %v450_v14 = vand.u32 4294901760, %v449_v11  ;;  %v476_v38 = vand.u32 4294901760, %v2138_v34  ;;  %v470_v42 = vsub.f32 %v2136_v33, %v469_v37 }
  0x49   : > { %1660 = vmatprep.subr.bf16.mxu0 %v1943_v0  ;;  %1588 = vmatprep.subr.bf16.mxu1 %v1943_v0  ;;  %v457_v30 = vand.u32 4294901760, %v456_v28  ;;  %v464_v31 = vand.u32 4294901760, %v463_v29  ;;  %v483_v49 = vand.u32 4294901760, %v2141_v35  ;;  %v490_v50 = vand.u32 4294901760, %v2143_v36 }
  0x4a   : > { %v2203_v25 = vpack.c.bf16 %v450_v14, %v443_v13  ;;  %v2213_v41 = vpack.c.bf16 %v476_v38, %v469_v37  ;;  %v477_v46 = vsub.f32 %v2138_v34, %v476_v38  ;;  %v471_v47 = vand.u32 4294901760, %v470_v42 }
  0x4b   : > { %v2211_v40 = vpack.c.bf16 %v464_v31, %v457_v30  ;;  %v2221_v55 = vpack.c.bf16 %v490_v50, %v483_v49  ;;  %v484_v57 = vsub.f32 %v2141_v35, %v483_v49  ;;  %v491_v61 = vsub.f32 %v2143_v36, %v490_v50 }
  0x4c   : > { %1662 = vmatpush3.bf16.msra.mxu0 %v2134_v32  ;;  %1590 = vmatpush3.bf16.msra.mxu1 %v2134_v32  ;;  %v478_v48 = vand.u32 4294901760, %v477_v46  ;;  %v497_v3 = vand.u32 4294901760, %v2151_v44  ;;  %v504_v4 = vand.u32 4294901760, %v2153_v45  ;;  %v511_v14 = vand.u32 4294901760, %v2162_v53 }
  0x4d   : > { %1663 = vmatprep.subr.bf16.mxu0 %v1943_v0  ;;  %1591 = vmatprep.subr.bf16.mxu1 %v1943_v0  ;;  %v485_v62 = vand.u32 4294901760, %v484_v57  ;;  %v492_v2 = vand.u32 4294901760, %v491_v61  ;;  %v518_v23 = vand.u32 4294901760, %v2164_v54  ;;  %v525_v38 = vand.u32 4294901760, %v2172_v58 }
  0x4e   : > { %v2219_v51 = vpack.c.bf16 %v478_v48, %v471_v47  ;;  %v2229_v6 = vpack.c.bf16 %v504_v4, %v497_v3  ;;  %v498_v7 = vsub.f32 %v2151_v44, %v497_v3  ;;  %v505_v10 = vsub.f32 %v2153_v45, %v504_v4 }
  0x4f   : > { %v2227_v5 = vpack.c.bf16 %v492_v2, %v485_v62  ;;  %v2237_v28 = vpack.c.bf16 %v518_v23, %v511_v14  ;;  %v512_v29 = vsub.f32 %v2162_v53, %v511_v14  ;;  %v519_v30 = vsub.f32 %v2164_v54, %v518_v23 }
  0x50   : > { %1665 = vmatpush3.bf16.msra.mxu0 %v2149_v43  ;;  %1593 = vmatpush3.bf16.msra.mxu1 %v2149_v43  ;;  %v499_v11 = vand.u32 4294901760, %v498_v7  ;;  %v506_v13 = vand.u32 4294901760, %v505_v10  ;;  %v532_v42 = vand.u32 4294901760, %v2175_v59  ;;  %v526_v48 = vsub.f32 %v2172_v58, %v525_v38 }
  0x51   : > { %1666 = vmatprep.subr.bf16.mxu0 %v1943_v0  ;;  %1594 = vmatprep.subr.bf16.mxu1 %v1943_v0  ;;  %v513_v31 = vand.u32 4294901760, %v512_v29  ;;  %v520_v37 = vand.u32 4294901760, %v519_v30  ;;  %v1625_v62 = vpack.c.bf16 %v2099_v16, %v2095_v12  ;;  %v1628_v2 = vpack.c.bf16 %v2103_v18, %v2101_v17 }
  0x52   : > { %v2235_v24 = vpack.c.bf16 %v506_v13, %v499_v11  ;;  %v2245_v47 = vpack.c.bf16 %v532_v42, %v525_v38  ;;  %v533_v49 = vsub.f32 %v2175_v59, %v532_v42  ;;  %v527_v50 = vand.u32 4294901760, %v526_v48 }
  0x53   : > { %v2243_v46 = vpack.c.bf16 %v520_v37, %v513_v31  ;;  %v1631_v3 = vpack.c.bf16 %v2107_v20, %v2105_v19  ;;  %v1634_v4 = vpack.c.bf16 %v2138_v34, %v2136_v33  ;;  %v1637_v7 = vpack.c.bf16 %v2143_v36, %v2141_v35  ;;  %v976_v20 = vld [vmem:[%s2442_s3] sm:$0xf] }
  0x54   : > { %1023 = vrot.lane.b32.xlu0 %v2145_v39, %s1945_s17  ;;  %1668 = vmatpush3.bf16.msra.mxu0 %v2160_v52  ;;  %v534_v57 = vand.u32 4294901760, %v533_v49  ;;  %v1640_v10 = vpack.c.bf16 %v2153_v45, %v2151_v44  ;;  %v1643_v11 = vpack.c.bf16 %v2164_v54, %v2162_v53  ;;  %v1646_v13 = vpack.c.bf16 %v2175_v59, %v2172_v58  ;;  %s1856_s17 = scalar_lea.vmem %s2394_s13, 128 }
  0x55   : > { %1669 = vmatprep.subr.bf16.mxu0 %v1943_v0  ;;  %1596 = vmatpush3.bf16.msra.mxu1 %v2160_v52  ;;  %v1948_v14 = vmov 2   ;;  %v1949_v23 = vmov 0   ;;  %v1950_v29 = vmov 1   ;;  %v1952_v49 = vmov 4   ;;  %p1857_p8 = scmp.ne.s32.totalorder %s2394_s13, %s1856_s17 }
  0x56   : > { %1597 = vmatprep.subr.bf16.mxu1 %v1943_v0  ;;  %v2249_v61 = vpack.c.bf16 %v534_v57, %v527_v50  ;;  %1810 = vset.pattern.permute.xlu0 %v1948_v14  ;;  %v1953_v12 = vmov 6   ;;  %v1955_v18 = vmov 5   ;;  %v983_v19 = vlaneseq }
  0x57   : > { %p1858_p11 = pnand %p1857_p8, %p2456_p10 }
  0x58   : > { %1671 = vmatpush3.bf16.msra.mxu0 %v2178_v60  ;;  %1041 = vperm.xlu0 %1810, %v2145_v39  }
  0x59   : > { %1672 = vmatprep.subr.bf16.mxu0 %v1943_v0  ;;  %1599 = vmatpush3.bf16.msra.mxu1 %v2178_v60  ;;  %p1859_p13 = pneg %p1858_p11 }
  0x5a   : > { %1600 = vmatprep.subr.bf16.mxu1 %v1943_v0 }
  0x5c   : > { %1811 = vset.pattern.permute.xlu0 %v1949_v23 }
  0x5d   : > { %1050 = vperm.xlu0 %1811, %v2145_v39  }
  0x61   : > { %1813 = vset.pattern.permute.xlu0 %v1950_v29 }
  0x62   : > { %1070 = vperm.xlu0 %1813, %v2145_v39  }
  0x66   : > { %1814 = vset.pattern.permute.xlu0 %v1948_v14 }
  0xcb   : > { %v309_v30 = vpop.xlane.xlu0 %308 }
  0xcc   : > { %v310_v31 = vsub.f32 %v2092_v1, %v309_v30 }
  0xce   : > { %v311_v37 = vmul.f32 1.442695, %v310_v31 }
  0xcf   : > { %v1024_v38 = vpop.permute.xlu0 %1023 }
  0xd0   : > { %1820 = vpow2.f32 %v311_v37  ;;  %v2274_v42 = vsub.f32 %v2145_v39, %v1024_v38 }
  0xd2   : > { %1028 = vrot.lane.b32.xlu1 %v2274_v42, %s1951_s24  ;;  %s1860_s24 = sshll.u32 %s1956_s21, 4  ;;  %s1861_s24 = int_to_ptr.vmem [resolvable:$false] %s1860_s24 }
  0xd3   : > { %s1862_s25 = scalar_lea.vmem %s1861_s24, 256  ;;  %p1863_p1 = scmp.lt.s32.totalorder %s2394_s13, %s1861_s24 }
  0xd4   : > { %p1864_p3 = scmp.lt.s32.totalorder %s1862_s25, %s1856_s17 }
  0xd6   : > { %1061 = vperm.xlu1 %1812, %v2145_v39   ;;  %p1865_p5 = por %p1864_p3, %p1863_p1 }
  0xd8   : > { %p1866_p6 = pnand %p1865_p5, %p1859_p13 }
  0xda   : > { %v1821_v48 = vpop.eup %1820  ;;  %1815 = vset.pattern.permute.xlu1 %v1952_v49 }
  0xdb   : > { %v2278_v50 = vand.u32 4294901760, %v1821_v48 }
  0xdd   : > { %v2281_v57 = vsub.f32 %v1821_v48, %v2278_v50 }
  0xdf   : > { %v416_v1 = vand.u32 4294901760, %v2281_v57 }
  0xe1   : > { %1504 = vmatmul.mubr.f32.vlgmr.msra.gmra.mrb[0].mxu0 %v416_v1  ;;  %v417_v23 = vsub.f32 %v2281_v57, %v416_v1 }
  0xe2   : > { %1674 = vmatpush3.bf16.msra.mxu0 %v2186_v63  ;;  %1538 = vmatprep.mubr.msk.f32.mxu0 %vm1946_vm0, %v1947_v56 }
  0xe3   : > { %1675 = vmatprep.subr.bf16.mxu0 %v1943_v0  ;;  %v418_v29 = vand.u32 4294901760, %v417_v23 }
  0xe5   : > { %1399 = vmatmul.mubr.f32.vlgmr.msra.gmra.mrb[0].mxu1 %v418_v29 }
  0xe6   : > { %1602 = vmatpush3.bf16.msra.mxu1 %v2195_v8  ;;  %1677 = vmatpush3.bf16.msra.mxu0 %v2197_v9 }
  0xe7   : > { %1603 = vmatprep.subr.bf16.mxu1 %v1943_v0  ;;  %1678 = vmatprep.subr.bf16.mxu0 %v1943_v0 }
  0xe8   : > { %1433 = vmatprep.mubr.msk.f32.mxu1 %vm1946_vm0, %v1947_v56 }
  0xea   : > { %1605 = vmatpush3.bf16.msra.mxu1 %v2203_v25  ;;  %1680 = vmatpush3.bf16.msra.mxu0 %v2205_v26 }
  0xeb   : > { %1606 = vmatprep.subr.bf16.mxu1 %v1943_v0  ;;  %1681 = vmatprep.subr.bf16.mxu0 %v1943_v0 }
  0xee   : > { %1608 = vmatpush3.bf16.msra.mxu1 %v2211_v40  ;;  %1683 = vmatpush3.bf16.msra.mxu0 %v2213_v41 }
  0xef   : > { %1609 = vmatprep.subr.bf16.mxu1 %v1943_v0  ;;  %1684 = vmatprep.subr.bf16.mxu0 %v1943_v0 }
  0xf2   : > { %1611 = vmatpush3.bf16.msra.mxu1 %v2219_v51  ;;  %1686 = vmatpush3.bf16.msra.mxu0 %v2221_v55 }
  0xf3   : > { %1612 = vmatprep.subr.bf16.mxu1 %v1943_v0  ;;  %1687 = vmatprep.subr.bf16.mxu0 %v1943_v0 }
  0xf6   : > { %1614 = vmatpush3.bf16.msra.mxu1 %v2227_v5  ;;  %1689 = vmatpush3.bf16.msra.mxu0 %v2229_v6 }
  0xf7   : > { %1615 = vmatprep.subr.bf16.mxu1 %v1943_v0  ;;  %1690 = vmatprep.subr.bf16.mxu0 %v1943_v0 }
  0xfa   : > { %1617 = vmatpush3.bf16.msra.mxu1 %v2235_v24  ;;  %1692 = vmatpush3.bf16.msra.mxu0 %v2237_v28 }
  0xfb   : > { %313 = vadd.xlane.f32.xlu1 %v1821_v48  ;;  %1618 = vmatprep.subr.bf16.mxu1 %v1943_v0 }
  0xfc   : > { %1693 = vmatprep.subr.bf16.mxu0 %v1943_v0 }
  0xfe   : > { %1620 = vmatpush3.bf16.msra.mxu1 %v2243_v46  ;;  %1695 = vmatpush3.bf16.msra.mxu0 %v2245_v47 }
  0xff   : > { %1621 = vmatprep.subr.bf16.mxu1 %v1943_v0  ;;  %1696 = vmatprep.subr.bf16.mxu0 %v1943_v0 }
 0x101   : > { %1539 = vmatmul.mubr.f32.vlgmr.msra.gmra.mrb[0].mxu0 %v2278_v50 }
 0x102   : > { %1623 = vmatpush3.bf16.msra.mxu1 %v2249_v61  ;;  %1698 = vmatpush3.bf16.msra.mxu0 %v2097_v15  ;;  %v1954_v15 = vmov 7  }
 0x103   : > { %1624 = vmatprep.subr.bf16.mxu1 %v1943_v0  ;;  %1699 = vmatprep.subr.bf16.mxu0 %v1943_v0 }
 0x104   : > { %1573 = vmatprep.mubr.msk.f32.mxu0 %vm1946_vm0, %v1947_v56 }
 0x105   : > { %1434 = vmatmul.mubr.f32.vlgmr.msra.gmra.mrb[0].mxu1 %v2278_v50 }
 0x106   : > { %1626 = vmatpush3.bf16.msra.mxu1 %v1625_v62  ;;  %1701 = vmatpush3.bf16.msra.mxu0 %v2111_v21  ;;  %v984_v21 = vshrl.u32 %v983_v19, 7 }
 0x107   : > { %1627 = vmatprep.subr.bf16.mxu1 %v1943_v0  ;;  %1702 = vmatprep.subr.bf16.mxu0 %v1943_v0 }
 0x108   : > { %1468 = vmatprep.mubr.msk.f32.mxu1 %vm1946_vm0, %v1947_v56  ;;  %v1007_v33 = vsub.s32 2, %v984_v21  ;;  %v985_v34 = vsub.s32 0, %v984_v21  ;;  %v996_v35 = vsub.s32 1, %v984_v21 }
 0x10a   : > { %1629 = vmatpush3.bf16.msra.mxu1 %v1628_v2  ;;  %1704 = vmatpush3.bf16.msra.mxu0 %v2117_v22  ;;  %v1033_v22 = vrot.slane %v976_v20, 6  ;;  %v1047_v44 = vrot.slane %v976_v20, %v1007_v33  ;;  %v1056_v45 = vrot.slane %v976_v20, %v985_v34 }
 0x10b   : > { %1630 = vmatprep.subr.bf16.mxu1 %v1943_v0  ;;  %1705 = vmatprep.subr.bf16.mxu0 %v1943_v0 }
 0x10c   : > { %980 = vperm.xlu1 %1815, %v2145_v39   ;;  %v1035_v36 = vsub.f32 %v976_v20, %v1033_v22 }
 0x10e   : > { %1632 = vmatpush3.bf16.msra.mxu1 %v1631_v3  ;;  %1707 = vmatpush3.bf16.msra.mxu0 %v2123_v27  ;;  %v1018_v27 = vsub.s32 3, %v984_v21 }
 0x10f   : > { %1633 = vmatprep.subr.bf16.mxu1 %v1943_v0  ;;  %1708 = vmatprep.subr.bf16.mxu0 %v1943_v0 }
 0x110   : > { %1817 = vset.pattern.permute.xlu1 %v1953_v12 }
 0x111   : > { %1002 = vperm.xlu1 %1817, %v2145_v39  }
 0x112   : > { %1635 = vmatpush3.bf16.msra.mxu1 %v1634_v4  ;;  %1710 = vmatpush3.bf16.msra.mxu0 %v2134_v32 }
 0x113   : > { %1636 = vmatprep.subr.bf16.mxu1 %v1943_v0  ;;  %1711 = vmatprep.subr.bf16.mxu0 %v1943_v0 }
 0x115   : > { %1818 = vset.pattern.permute.xlu1 %v1954_v15 }
 0x116   : > { %1638 = vmatpush3.bf16.msra.mxu1 %v1637_v7  ;;  %1713 = vmatpush3.bf16.msra.mxu0 %v2149_v43  ;;  %v1067_v43 = vrot.slane %v976_v20, %v1018_v27 }
 0x117   : > { %1639 = vmatprep.subr.bf16.mxu1 %v1943_v0  ;;  %1714 = vmatprep.subr.bf16.mxu0 %v1943_v0 }
 0x118   : > { %1013 = vperm.xlu1 %1818, %v2145_v39  }
 0x11a   : > { %1641 = vmatpush3.bf16.msra.mxu1 %v1640_v10  ;;  %1716 = vmatpush3.bf16.msra.mxu0 %v2160_v52  ;;  %v1037_v52 = vrot.slane %v1035_v36, 1  ;;  %v977_v10 = vld [vmem:[%s2443_s4] sm:$0xf] }
 0x11b   : > { %1642 = vmatprep.subr.bf16.mxu1 %v1943_v0  ;;  %1717 = vmatprep.subr.bf16.mxu0 %v1943_v0  ;;  %v1008_v48 = vrot.slane %v977_v10, %v1007_v33 }
 0x11c   : > { %v1039_v63 = vmul.f32 %v1037_v52, %v1035_v36 }
 0x11e   : > { %1644 = vmatpush3.bf16.msra.mxu1 %v1643_v11  ;;  %1719 = vmatpush3.bf16.msra.mxu0 %v2178_v60  ;;  %v1089_v51 = vrot.slane %v1039_v63, %v1007_v33  ;;  %v986_v11 = vrot.slane %v977_v10, %v985_v34 }
 0x11f   : > { %1645 = vmatprep.subr.bf16.mxu1 %v1943_v0  ;;  %v1042_v0 = vpop.permute.xlu0 %1041 }
 0x120   : > { %v1048_v58 = vmin.f32 %v1042_v0, %v1047_v44  ;;  %v1092_v8 = vmax.f32 %v1042_v0, %v1047_v44 }
 0x121   : > { %1574 = vmatmul.mubr.f32.vlgmr.msra.gmra.mrb[0].mxu0 %v2278_v50  ;;  %v1019_v50 = vrot.slane %v977_v10, %v1018_v27 }
 0x122   : > { %1647 = vmatpush3.bf16.msra.mxu1 %v1646_v13 }
 0x123   : > { %v1051_v32 = vpop.permute.xlu0 %1050 }
 0x124   : > { %v1057_v59 = vmax.f32 %v1051_v32, %v1056_v45  ;;  %v1093_v9 = vmin.f32 %v1051_v32, %v1056_v45 }
 0x125   : > { %1469 = vmatmul.mubr.f32.vlgmr.msra.gmra.mrb[0].mxu1 %v2281_v57 }
 0x126   : > { %v1058_v26 = vsub.f32 %v1048_v58, %v1057_v59  ;;  %v1094_v6 = vsub.f32 %v1092_v8, %v1093_v9 }
 0x127   : > { %v1071_v54 = vpop.permute.xlu0 %1070 }
 0x128   : > { %v1059_v5 = vmax.f32 %v1058_v26, 0.0  ;;  %v1095_v61 = vmax.f32 %v1094_v6, 0.0 }
 0x144   : > { %v1029_v16 = vpop.permute.xlu1 %1028 }
 0x145   : > { %v1031_v17 = vmul.f32 %v1029_v16, %v2274_v42 }
 0x147   : > { %1083 = vperm.xlu0 %1814, %v1031_v17  }
 0x14b   : > { %1816 = vset.pattern.permute.xlu0 %v1955_v18 }
 0x14c   : > { %991 = vperm.xlu0 %1816, %v2145_v39   ;;  %v1076_v39 = vrot.slane %v976_v20, %v996_v35 }
 0x14e   : > { %v1077_v60 = vmax.f32 %v1071_v54, %v1076_v39  ;;  %v1097_v41 = vmin.f32 %v1071_v54, %v1076_v39 }
 0x150   : > { %1819 = vset.pattern.permute.xlu0 %v1948_v14  ;;  %v997_v14 = vrot.slane %v977_v10, %v996_v35 }
 0x155   : > { %v1062_v53 = vpop.permute.xlu1 %1061 }
 0x156   : > { %v1068_v56 = vmin.f32 %v1062_v53, %v1067_v43  ;;  %v1096_v25 = vmax.f32 %v1062_v53, %v1067_v43 }
 0x158   : > { %v1078_v40 = vsub.f32 %v1068_v56, %v1077_v60  ;;  %v1098_v28 = vsub.f32 %v1096_v25, %v1097_v41 }
 0x15a   : > { %v1079_v24 = vmax.f32 %v1078_v40, 0.0  ;;  %v1099_v62 = vmax.f32 %v1098_v28, 0.0 }
 0x15c   : > { %v1080_v2 = vmul.f32 %v1079_v24, %v1059_v5  ;;  %v1100_v4 = vmul.f32 %v1099_v62, %v1095_v61 }
 0x188   : > { %v314_v47 = vpop.xlane.xlu1 %313 }
 0x189   : > { %1822 = vrcp.f32 %v314_v47 }
 0x18c   : > { %v981_v7 = vpop.permute.xlu1 %980 }
 0x18d   : > { %v987_v42 = vsub.f32 %v981_v7, %v986_v11 }
 0x18f   : > { %v988_v17 = vand.u32 2147483647, %v987_v42 }
 0x190   : > { %v1003_v13 = vpop.permute.xlu1 %1002 }
 0x191   : > { %v1009_v18 = vsub.f32 %v1003_v13, %v1008_v48 }
 0x193   : > { %v1823_v38 = vpop.eup %1822  ;;  %v1010_v27 = vand.u32 2147483647, %v1009_v18 }
 0x194   : > { %v316_v29 = vmul.f32 -1.0, %v1823_v38 }
 0x197   : > { %v1014_v23 = vpop.permute.xlu1 %1013 }
 0x198   : > { %v1020_v21 = vsub.f32 %v1014_v23, %v1019_v50 }
 0x19a   : > { %v1021_v35 = vand.u32 2147483647, %v1020_v21 }
 0x1c6   : > { %v1084_v55 = vpop.permute.xlu0 %1083 }
 0x1c7   : > { %v1090_v46 = vadd.f32 %v1089_v51, %v1084_v55 }
 0x1c9   : > { %v1091_v3 = vsub.f32 %v1090_v46, %v1080_v2 }
 0x1cb   : > { %1824 = vrcp.f32 %v1091_v3  ;;  %v992_v31 = vpop.permute.xlu0 %991 }
 0x1cc   : > { %1826 = vrcp.f32 %v1100_v4  ;;  %v998_v49 = vsub.f32 %v992_v31, %v997_v14 }
 0x1ce   : > { %v999_v20 = vand.u32 2147483647, %v998_v49 }
 0x1d5   : > { %v1825_v57 = vpop.eup %1824 }
 0x1d6   : > { %v1827_v16 = vpop.eup %1826  ;;  %v1102_v19 = vmul.f32 %v1825_v57, %v1080_v2 }
 0x1d7   : > { %v1104_v22 = vmul.f32 %v1827_v16, %v1091_v3 }
 0x1d9   : > { %v1105_v33 = vadd.f32 %v1104_v22, %v1102_v19 }
 0x1db   : > { %v1106_v44 = vsub.f32 1.0, %v1105_v33 }
 0x1f4   : > { %v970_v30 = vpop.f32.mrb[0].mxu0 }
 0x1f5   : > { %v1575_v37 = vpop.f32.mrb[1].mxu0 }
 0x1f8   : > { %v675_v1 = vpop.f32.mrb[0].mxu1 }
 0x1f9   : > { %v1720_v12 = vadd.f32 %v970_v30, %v675_v1  ;;  %v1470_v15 = vpop.f32.mrb[1].mxu1 }
 0x1fb   : > { %v974_v0 = vmul.f32 %v1720_v12, %v316_v29 }
 0x1fd   : > { %v989_v32 = vadd.f32 %v988_v17, %v974_v0 }
 0x1ff   : > { %v1000_v34 = vadd.f32 %v999_v20, %v989_v32 }
 0x201   : > { %v1011_v36 = vadd.f32 %v1010_v27, %v1000_v34 }
 0x203   : > { %v1022_v43 = vadd.f32 %v1021_v35, %v1011_v36 }
 0x205   : > { %v1107_v45 = vadd.f32 %v1106_v44, %v1022_v43 }
 0x207   : > { %1108 = vst [vmem:[%s290_s10] sm:$0xff] %v1107_v45 }
 0x208   : > { %1869 = shalt.err (!%p1866_p6)
}
 0x209   : > { %s1870_s27 = scalar_lea.hbm %s2392_s15, 128  ;;  %s1874_s12 = scalar_lea.hbm %s2444_s5, 256 }
 0x20a   : > { %p1871_p7 = scmp.ne.s32.totalorder %s2392_s15, %s1870_s27  ;;  %p1875_p0 = scmp.lt.u32.totalorder %s2392_s15, %s2444_s5 }
 0x20b   : > { %p1876_p2 = scmp.lt.u32.totalorder %s1874_s12, %s1870_s27  ;;  %p1878_p8 = scmp.lt.u32.totalorder %s1870_s27, %s2392_s15 }
 0x20c   : > { %p1872_p9 = pnand %p1871_p7, %p2456_p10 }
 0x20d   : > { %p1877_p4 = por %p1876_p2, %p1875_p0 }
 0x20e   : > { %p1873_p12 = pneg %p1872_p9 }
 0x20f   : > { %p1879_p11 = por %p1878_p8, %p1877_p4 }
 0x211   : > { %p1880_p13 = pnand %p1879_p11, %p1873_p12 }
 0x213   : > { %1883 = shalt.err (!%p1880_p13)
}
 0x214   : > { %1733 = dma.vmem_to_hbm [thread:$0]  (%p2456_p10), %s2394_s13, 128, %s2392_s15, %s1110_s16  }
 0x215 PF: > { %p1745_p1 = scmp.ge.s32.totalorder %s1938_s23, 2  ;;  %s1136_s10 = sand.u32 1, %s1918_s18  }
 0x216   : > { %p2457_p3 = scmp.ne.s32.totalorder %s2450_s30, 0  ;;  %s1137_s14 = scalar_lea.sflag [#allocation4], %s1136_s10 }
 0x218   : > { %p1740_p5 = pnand %p1745_p1, %p2457_p3 }
 0x21a   : > { %1913 = dma.done.wait (!%p1740_p5), %s1137_s14, 128  }
 0x21b   : > { %1915 = vsyncadd (!%p1740_p5), %s1137_s14, 4294967168  ;;  %s19_s23 = sadd.s32 1, %s1938_s23   ;;  %s2458_s18 = smov %s1922_s19 }
 0x21c   : > { %p16_p6 = scmp.ge.s32.totalorder %s19_s23, 4   ;;  %s2459_s19 = smov %s1926_s20 }
 0x21d   : > { %s2460_s20 = smov %s2040_s6  ;;  %s2461_s21 = smov %s1934_s22 }
 0x21e   : > { %s2462_s22 = smov %s2464_s26  ;;  %18 = sbr.rel (!%p16_p6) target bundleno = 5 (0x5), region = 90 }
 0x225   :  { %1142 = vsyncpa [#allocation3], 1 }
 0x226   :  { %1144 = vsyncpa [#allocation3 + $0x1], 1 }
 0x227   :  { %1145 = vsyncpa [#allocation4], 1 }
 0x228   :  { %1147 = vsyncpa [#allocation4 + $0x1], 1 }

</bundles_post_ra>
